<compile_context>
chip_gen: v7x
topology: tpu7x:2x2x1
jax: 0.10.0
libtpu: 0.0.40
codegen_flags: <defaults>
</compile_context>

<pallas_src>
import functools
import math

import jax
import jax.numpy as jnp
import numpy as np
from jax.experimental import pallas as pl
from jax.experimental.pallas import tpu as pltpu


# ----------------------------- Pallas kernel --------------------------------

def _conv_bias_squash_kernel(a_ref, w_ref, b_ref, seg_ref, o_ref):
    """Fused conv-matmul + bias + capsule squash on one lane-packed row tile.

    a:   (tm4, P*Kdim)     P im2col patch rows packed per output row
    w:   (P*Kdim, P*Cout)  block-diagonal replicated conv weight
    b:   (1, P*Cout)       bias row tiled P times
    seg: (P*Cout, P*Cout)  block-diagonal ones (capsule segment-sum/broadcast)
    o:   (tm4, P*Cout)     squashed conv output, lane-dense
    """
    # conv as matmul + bias, f32 accumulation on the MXU.
    v = jnp.dot(a_ref[...], w_ref[...],
                preferred_element_type=jnp.float32) + b_ref[...]
    # Per-capsule squared lengths broadcast back onto each capsule's lanes via
    # the block-diagonal ones matrix (MXU; stays lane-dense, no cross-lane
    # reshapes or reductions over a last dim of 4).
    l2 = jnp.dot(v * v, seg_ref[...], preferred_element_type=jnp.float32)
    # squash scale ||v|| / (1 + ||v||^2): EUP approx reciprocal plus one
    # Newton-Raphson step recovers ~f32 accuracy while keeping the divide off
    # the VPU.  (NaN-safe at v == 0, unlike the reference l2/(1+l2)/l chain.)
    d = 1.0 + l2
    r = pl.reciprocal(d, approx=True)
    r = r * (2.0 - d * r)
    o_ref[...] = (v * (jnp.sqrt(l2) * r)).astype(o_ref.dtype)


# ------------------------------ host wrapper --------------------------------

@functools.partial(
    jax.jit,
    static_argnames=("output_caps", "output_dim", "kernel_size", "stride",
                     "use_bf16_inputs"))
def primary_caps_forward(x, weight, bias, *, output_caps, output_dim,
                         kernel_size, stride, use_bf16_inputs=False):
    """Equivalent of PrimaryCapsLayer.forward.

    x:      (N, Cin, H, W)    float32  (NCHW, like PyTorch)
    weight: (Cout, Cin, K, K) with Cout = output_caps * output_dim
    bias:   (Cout,)
    returns (N, output_caps * Ho * Wo, output_dim)
    """
    N, Cin, H, W = x.shape
    K = kernel_size
    Ho = (H - K) // stride + 1
    Wo = (W - K) // stride + 1
    Cout = output_caps * output_dim
    Kdim = Cin * K * K

    # -- im2col written directly in its final layout (no transpose of the
    #    expanded tensor).  Rows ordered (n, ho, wo); columns ordered
    #    (kh, kw, c); the conv weight is flattened to match below.
    # TODO(synk): fold this strided window gather into the Pallas pipeline.
    x_nhwc = jnp.transpose(x, (0, 2, 3, 1))               # raw-x pass only
    windows = [x_nhwc[:, i:i + stride * Ho:stride, j:j + stride * Wo:stride, :]
               for i in range(K) for j in range(K)]
    patches = jnp.stack(windows, axis=3)                  # (N, Ho, Wo, K*K, Cin)
    patches = patches.reshape(N * Ho * Wo, Kdim)          # free reshape

    # PyTorch OIHW weight -> (kh, kw, c)-ordered matmul weight (tiny tensor).
    w_mat = jnp.transpose(weight, (2, 3, 1, 0)).reshape(Kdim, Cout)

    # -- lane packing: P patch rows -> one 128-lane output row ----------------
    P = (128 // Cout) if (Cout <= 128 and 128 % Cout == 0) else 1
    lane = P * Cout
    w_big = jnp.kron(jnp.eye(P, dtype=w_mat.dtype), w_mat)   # (P*Kdim, lane)
    b_big = jnp.tile(bias.astype(jnp.float32).reshape(1, Cout), (1, P))
    seg_big = jnp.kron(jnp.eye(P * output_caps, dtype=jnp.float32),
                       jnp.ones((output_dim, output_dim), jnp.float32))

    # -- row tiling: even grid (>=2) so both v7x TensorCores work, up to
    #    ~2048 original rows per tile, tile derived from the grid count so
    #    ragged R does not blow up the padding.
    R = N * Ho * Wo
    R4 = math.ceil(R / P)                           # packed rows needed
    grid_n = max(2, math.ceil(R4 / 512))
    grid_n += grid_n % 2                            # even grid count (v7x)
    tm4 = max(8, math.ceil(math.ceil(R4 / grid_n) / 8) * 8)
    R4_pad = grid_n * tm4
    R_pad = R4_pad * P

    patches_p = jnp.pad(patches, ((0, R_pad - R), (0, 0)))
    packed = patches_p.reshape(R4_pad, P * Kdim)    # free row-major lane pack

    if use_bf16_inputs:  # optional: halves input HBM traffic; f32 accumulation
        packed = packed.astype(jnp.bfloat16)
        w_big = w_big.astype(jnp.bfloat16)

    out_packed = pl.pallas_call(
        _conv_bias_squash_kernel,
        out_shape=jax.ShapeDtypeStruct((R4_pad, lane), jnp.float32),
        grid=(grid_n,),
        in_specs=[
            pl.BlockSpec((tm4, P * Kdim), lambda i: (i, 0)),
            pl.BlockSpec((P * Kdim, lane), lambda i: (0, 0)),
            pl.BlockSpec((1, lane), lambda i: (0, 0)),
            pl.BlockSpec((lane, lane), lambda i: (0, 0)),
        ],
        out_specs=pl.BlockSpec((tm4, lane), lambda i: (i, 0)),
        compiler_params=pltpu.CompilerParams(
            dimension_semantics=("parallel",),
            vmem_limit_bytes=32 * 1024 * 1024),
    )(packed, w_big, b_big, seg_big)

    conv_caps = out_packed.reshape(R_pad, Cout)[:R]  # free unpack + slice

    # -- reorder (XLA glue) to the PyTorch capsule layout: (N, caps*Ho*Wo, dim)
    #    (kept outside the kernel: writing caps-major from the kernel would
    #     force 4-lane strided stores).
    caps = conv_caps.reshape(N, Ho, Wo, output_caps, output_dim)
    caps = caps.transpose(0, 3, 1, 2, 4).reshape(N, output_caps * Ho * Wo,
                                                 output_dim)
    return caps


# ------------------------------ pure-JAX reference ---------------------------

def _reference_forward(x, weight, bias, output_caps, output_dim, stride):
    out = jax.lax.conv_general_dilated(
        x, weight, window_strides=(stride, stride), padding="VALID",
        dimension_numbers=("NCHW", "OIHW", "NCHW"))
    out = out + bias[None, :, None, None]
    N, C, H, W = out.shape
    out = out.reshape(N, output_caps, output_dim, H, W)
    out = out.transpose(0, 1, 3, 4, 2).reshape(N, -1, output_dim)
    lengths2 = jnp.sum(out ** 2, axis=2, keepdims=True)
    lengths = jnp.sqrt(lengths2)
    return out * (lengths2 / (1.0 + lengths2) / lengths)


# ----------------------------------- main ------------------------------------

if __name__ == "__main__":
    # Module hyperparameters (small, consistent with PrimaryCapsLayer.__init__)
    input_channels = 4
    output_caps = 8
    output_dim = 4
    kernel_size = 3
    stride = 2
    Cout = output_caps * output_dim

    key = jax.random.PRNGKey(0)
    kw, kb, kx = jax.random.split(key, 3)
    weight = jax.random.normal(
        kw, (Cout, input_channels, kernel_size, kernel_size), jnp.float32) * 0.1
    bias = jax.random.normal(kb, (Cout,), jnp.float32) * 0.1
    x = jax.random.normal(kx, (2, input_channels, 16, 16), jnp.float32)

    out = primary_caps_forward(
        x, weight, bias,
        output_caps=output_caps, output_dim=output_dim,
        kernel_size=kernel_size, stride=stride)
    out = jax.block_until_ready(out)

    ref = jax.block_until_ready(
        _reference_forward(x, weight, bias, output_caps, output_dim, stride))

    assert out.shape == ref.shape, (out.shape, ref.shape)
    np.testing.assert_allclose(np.asarray(out), np.asarray(ref),
                               rtol=1e-5, atol=1e-5)
    print("KERNEL_OK")
</pallas_src>

<mosaic_0001>
module attributes {stable_mosaic.version = 11 : i64} {
  func.func @_conv_bias_squash_kernel(%arg0: i32, %arg1: memref<16x144xf32, #tpu.memory_space<vmem>>, %arg2: memref<144x128xf32, #tpu.memory_space<vmem>>, %arg3: memref<1x128xf32, #tpu.memory_space<vmem>>, %arg4: memref<128x128xf32, #tpu.memory_space<vmem>>, %arg5: memref<16x128xf32, #tpu.memory_space<vmem>>) attributes {dimension_semantics = [#tpu.dimension_semantics<parallel>], iteration_bounds = array<i64: 2>, scalar_prefetch = 0 : i64, scratch_operands = 0 : i64, tpu.core_type = #tpu.core_type<tc>, window_params = [{transform_indices = @transform_0, window_bounds = array<i64: 16, 144>}, {pipeline_mode = #tpu.pipeline_mode<synchronous>, transform_indices = @transform_1, window_bounds = array<i64: 144, 128>}, {pipeline_mode = #tpu.pipeline_mode<synchronous>, transform_indices = @transform_2, window_bounds = array<i64: 1, 128>}, {pipeline_mode = #tpu.pipeline_mode<synchronous>, transform_indices = @transform_3, window_bounds = array<i64: 128, 128>}, {transform_indices = @transform_4, window_bounds = array<i64: 16, 128>}]} {
    %c0 = arith.constant 0 : index
    %c0_0 = arith.constant 0 : index
    %0 = vector.load %arg1[%c0, %c0_0] : memref<16x144xf32, #tpu.memory_space<vmem>>, vector<16x144xf32>
    %c0_1 = arith.constant 0 : index
    %c0_2 = arith.constant 0 : index
    %1 = vector.load %arg2[%c0_1, %c0_2] : memref<144x128xf32, #tpu.memory_space<vmem>>, vector<144x128xf32>
    %cst = arith.constant dense<0.000000e+00> : vector<16x128xf32>
    %2 = tpu.matmul %0, %1, %cst {dimension_numbers = #tpu.dot_dimension_numbers<[1], [0], [0], [1], [0, 0, 1, 1], [], []>} : vector<16x144xf32>, vector<144x128xf32>, vector<16x128xf32> -> vector<16x128xf32>
    %c0_3 = arith.constant 0 : index
    %c0_4 = arith.constant 0 : index
    %3 = vector.load %arg3[%c0_3, %c0_4] : memref<1x128xf32, #tpu.memory_space<vmem>>, vector<1x128xf32>
    %4 = vector.broadcast %3 : vector<1x128xf32> to vector<16x128xf32>
    %5 = arith.addf %2, %4 : vector<16x128xf32>
    %6 = arith.mulf %5, %5 : vector<16x128xf32>
    %c0_5 = arith.constant 0 : index
    %c0_6 = arith.constant 0 : index
    %7 = vector.load %arg4[%c0_5, %c0_6] : memref<128x128xf32, #tpu.memory_space<vmem>>, vector<128x128xf32>
    %cst_7 = arith.constant dense<0.000000e+00> : vector<16x128xf32>
    %8 = tpu.matmul %6, %7, %cst_7 {dimension_numbers = #tpu.dot_dimension_numbers<[1], [0], [0], [1], [0, 0, 1, 1], [], []>} : vector<16x128xf32>, vector<128x128xf32>, vector<16x128xf32> -> vector<16x128xf32>
    %cst_8 = arith.constant 1.000000e+00 : f32
    %9 = vector.broadcast %cst_8 : f32 to vector<16x128xf32>
    %10 = arith.addf %9, %8 : vector<16x128xf32>
    %11 = tpu.reciprocal %10 {approx = true} : vector<16x128xf32> -> vector<16x128xf32>
    %12 = arith.mulf %10, %11 : vector<16x128xf32>
    %cst_9 = arith.constant 2.000000e+00 : f32
    %13 = vector.broadcast %cst_9 : f32 to vector<16x128xf32>
    %14 = arith.subf %13, %12 : vector<16x128xf32>
    %15 = arith.mulf %11, %14 : vector<16x128xf32>
    %16 = math.sqrt %8 : vector<16x128xf32>
    %17 = arith.mulf %16, %15 : vector<16x128xf32>
    %18 = arith.mulf %5, %17 : vector<16x128xf32>
    %c0_10 = arith.constant 0 : index
    %c0_11 = arith.constant 0 : index
    %19 = vector.load %arg5[%c0_10, %c0_11] : memref<16x128xf32, #tpu.memory_space<vmem>>, vector<16x128xf32>
    tpu.vector_store %arg5[%c0_10, %c0_11], %18 {strides = array<i32>} : memref<16x128xf32, #tpu.memory_space<vmem>>, vector<16x128xf32>,
    return
  }
  func.func @transform_0(%arg0: i32) -> (i32, i32) {
    %c0_i32 = arith.constant 0 : i32
    %c0_i32_0 = arith.constant 0 : i32
    return %arg0, %c0_i32 : i32, i32
  }
  func.func @transform_1(%arg0: i32) -> (i32, i32) {
    %c0_i32 = arith.constant 0 : i32
    %c0_i32_0 = arith.constant 0 : i32
    %c0_i32_1 = arith.constant 0 : i32
    return %c0_i32, %c0_i32_0 : i32, i32
  }
  func.func @transform_2(%arg0: i32) -> (i32, i32) {
    %c0_i32 = arith.constant 0 : i32
    %c0_i32_0 = arith.constant 0 : i32
    %c0_i32_1 = arith.constant 0 : i32
    return %c0_i32, %c0_i32_0 : i32, i32
  }
  func.func @transform_3(%arg0: i32) -> (i32, i32) {
    %c0_i32 = arith.constant 0 : i32
    %c0_i32_0 = arith.constant 0 : i32
    %c0_i32_1 = arith.constant 0 : i32
    return %c0_i32, %c0_i32_0 : i32, i32
  }
  func.func @transform_4(%arg0: i32) -> (i32, i32) {
    %c0_i32 = arith.constant 0 : i32
    %c0_i32_0 = arith.constant 0 : i32
    return %arg0, %c0_i32 : i32, i32
  }
}

</mosaic_0001>

<bundles_post_ra>
// kernel: mul.4
= control target key start
LH: loop header
LB: loop body
LE: loop exit
PB: predicated region body
PF: predicated region fallthrough
CT: control target
= control target key end

     0   :  { %vm46_vm0 = vcmask 261120   ;;  %s184_s0 = inlined_call_operand.vmem [shape: f32[3,3,4,32], index: 0, kind: input, shape index: {}]   ;;  %s185_s1 = inlined_call_operand.vmem [shape: f32[36,32], index: 1, kind: output, shape index: {}]  }
   0x1   :  { %v95_v0 = vld [vmem:[%s184_s0 + $0x20] sm:$0xf]  ;;  %v96_v1 = vld [vmem:[%s184_s0 + $0x1c] sm:$0xf]  ;;  %v97_v2 = vld [vmem:[%s184_s0 + $0x18] sm:$0xf] }
   0x2   :  { %8 = vst [vmem:[#allocation0 + $0x40] sm:$0xf] %v95_v0  ;;  %13 = vst [vmem:[#allocation0 + $0x38] sm:$0xf] %v96_v1  ;;  %v98_v3 = vld [vmem:[%s184_s0 + $0x14] sm:$0xf] }
   0x3   :  { %18 = vst [vmem:[#allocation0 + $0x30] sm:$0xf] %v97_v2  ;;  %v99_v4 = vld [vmem:[%s184_s0 + $0x10] sm:$0xf]  ;;  %v100_v5 = vld [vmem:[%s184_s0 + $0xc] sm:$0xf] }
   0x4   :  { %23 = vst [vmem:[#allocation0 + $0x28] sm:$0xf] %v98_v3  ;;  %28 = vst [vmem:[#allocation0 + $0x20] sm:$0xf] %v99_v4  ;;  %v101_v6 = vld [vmem:[%s184_s0 + $0x8] sm:$0xf] }
   0x5   :  { %33 = vst [vmem:[#allocation0 + $0x18] sm:$0xf] %v100_v5  ;;  %v102_v7 = vld [vmem:[%s184_s0 + $0x4] sm:$0xf]  ;;  %v43_v8 = vld [vmem:[%s184_s0] sm:$0xf] }
   0x6   :  { %38 = vst [vmem:[#allocation0 + $0x10] sm:$0xf] %v101_v6  ;;  %42 = vst [vmem:[#allocation0 + $0x8] sm:$0xf] %v102_v7 }
   0x7   :  { %44 = vst [vmem:[#allocation0] sm:$0xf] %v43_v8 }
   0x9   :  { %v79_v10 = vld [vmem:[#allocation0 + $0x38] sm:$0xf]   ;;  %v84_v11 = vld [vmem:[#allocation0 + $0x40] sm:$0xf]  }
   0xa   :  { %v74_v9 = vld [vmem:[#allocation0 + $0x30] sm:$0xf]   ;;  %109 = vst.msk [vmem:[%s185_s1 + $0x1c] sm:$0xf] %vm46_vm0, %v79_v10   ;;  %110 = vst.msk [vmem:[%s185_s1 + $0x20] sm:$0xf] %vm46_vm0, %v84_v11  }
   0xb   :  { %v64_v13 = vld [vmem:[#allocation0 + $0x20] sm:$0xf]   ;;  %v69_v14 = vld [vmem:[#allocation0 + $0x28] sm:$0xf]   ;;  %108 = vst.msk [vmem:[%s185_s1 + $0x18] sm:$0xf] %vm46_vm0, %v74_v9  }
   0xc   :  { %v59_v12 = vld [vmem:[#allocation0 + $0x18] sm:$0xf]   ;;  %106 = vst.msk [vmem:[%s185_s1 + $0x10] sm:$0xf] %vm46_vm0, %v64_v13   ;;  %107 = vst.msk [vmem:[%s185_s1 + $0x14] sm:$0xf] %vm46_vm0, %v69_v14  }
   0xd   :  { %v49_v16 = vld [vmem:[#allocation0 + $0x8] sm:$0xf]   ;;  %v54_v17 = vld [vmem:[#allocation0 + $0x10] sm:$0xf]   ;;  %105 = vst.msk [vmem:[%s185_s1 + $0xc] sm:$0xf] %vm46_vm0, %v59_v12  }
   0xe   :  { %v45_v15 = vld [vmem:[#allocation0] sm:$0xf]   ;;  %103 = vst.msk [vmem:[%s185_s1 + $0x4] sm:$0xf] %vm46_vm0, %v49_v16   ;;  %104 = vst.msk [vmem:[%s185_s1 + $0x8] sm:$0xf] %vm46_vm0, %v54_v17  }
   0xf   :  { %47 = vst.msk [vmem:[%s185_s1] sm:$0xf] %vm46_vm0, %v45_v15  }

// kernel: primary_caps_forward.1
= control target key start
LH: loop header
LB: loop body
LE: loop exit
PB: predicated region body
PF: predicated region fallthrough
CT: control target
= control target key end

     0   :  { %s673_s15 = smov 0   ;;  %s816_s0 = inlined_call_operand.vmem [shape: f32[32,144], index: 0, kind: input, shape index: {}]   ;;  %s817_s1 = inlined_call_operand.vmem [shape: f32[144,128], index: 1, kind: input, shape index: {}]   ;;  %s818_s2 = inlined_call_operand.vmem [shape: f32[1,128], index: 2, kind: input, shape index: {}]   ;;  %s819_s3 = inlined_call_operand.vmem [shape: f32[128,128], index: 3, kind: input, shape index: {}]   ;;  %s820_s4 = inlined_call_operand.vmem [shape: f32[32,128], index: 4, kind: output, shape index: {}]  }
   0x1 LB: > { %s494_s16 = sadd.s32 4294967295, %s645_s15   ;;  %p498_p0 = scmp.ge.s32.totalorder %s645_s15, 1  ;;  %s645_s15 = sphi %s673_s15, %s14_s15  }
   0x2   : > { %p164_p1 = scmp.lt.s32.totalorder %s645_s15, 3 }
   0x4   : > { %p165_p2 = pnand %p498_p0, %p164_p1 }
   0x5   : > { %v208_v0 = vld [vmem:[%s817_s1] sm:$0xff] (!%p165_p2)  ;;  %v209_v1 = vld [vmem:[%s817_s1 + $0x8] sm:$0xff] (!%p165_p2)  ;;  %v210_v2 = vld [vmem:[%s817_s1 + $0x10] sm:$0xff] (!%p165_p2)  ;;  %s499_s23 = sshll.u32 (!%p165_p2), %s494_s16, 1  ;;  %v647_v3 = vmov (!%p165_p2), 0.0|0.0   ;;  %vm233_vm0 = vcmask (!%p165_p2), 130048  }
   0x6   : > { %168 = sbr.rel (%p165_p2) target bundleno = 500 (0x1f4), region = 36  ;;  %563 = vmatprep.subr.bf16.mxu0 (!%p165_p2), %v647_v3  ;;  %v564_v4 = vpack.c.bf16 (!%p165_p2), %v209_v1, %v208_v0  ;;  %v211_v5 = vld [vmem:[%s817_s1 + $0x18] sm:$0xff] (!%p165_p2)  ;;  %p192_p3 = scmp.lt.s32.totalorder (!%p165_p2), %s499_s23, 3  ;;  %v212_v7 = vld [vmem:[%s817_s1 + $0x20] sm:$0xff] (!%p165_p2)  ;;  %v213_v8 = vld [vmem:[%s817_s1 + $0x28] sm:$0xff] (!%p165_p2) }
   0x7   : > { %v567_v6 = vpack.c.bf16 (!%p165_p2), %v211_v5, %v210_v2  ;;  %v317_v9 = vld [vmem:[%s819_s3] sm:$0xff] (!%p165_p2)  ;;  %v318_v10 = vld [vmem:[%s819_s3 + $0x8] sm:$0xff] (!%p165_p2)  ;;  %v319_v11 = vld [vmem:[%s819_s3 + $0x10] sm:$0xff] (!%p165_p2)  ;;  %v570_v12 = vpack.c.bf16 (!%p165_p2), %v213_v8, %v212_v7 }
   0x8   : > { %565 = vmatpush1.bf16.msra.mxu0 (!%p165_p2), %v564_v4  ;;  %v214_v13 = vld [vmem:[%s817_s1 + $0x30] sm:$0xff] (!%p165_p2)  ;;  %v590_v15 = vpack.c.bf16 (!%p165_p2), %v318_v10, %v317_v9  ;;  %v215_v16 = vld [vmem:[%s817_s1 + $0x38] sm:$0xff] (!%p165_p2)  ;;  %v321_v18 = vld [vmem:[%s819_s3 + $0x20] sm:$0xff] (!%p165_p2) }
   0x9   : > { %566 = vmatprep.subr.bf16.mxu0 (!%p165_p2), %v647_v3  ;;  %v320_v17 = vld [vmem:[%s819_s3 + $0x18] sm:$0xff] (!%p165_p2)  ;;  %v322_v20 = vld [vmem:[%s819_s3 + $0x28] sm:$0xff] (!%p165_p2)  ;;  %v573_v21 = vpack.c.bf16 (!%p165_p2), %v215_v16, %v214_v13  ;;  %v216_v22 = vld [vmem:[%s817_s1 + $0x40] sm:$0xff] (!%p165_p2) }
   0xa   : > { %591 = vmatprep.subr.bf16.mxu1 (!%p165_p2), %v590_v15  ;;  %v594_v19 = vpack.c.bf16 (!%p165_p2), %v320_v17, %v319_v11  ;;  %v598_v23 = vpack.c.bf16 (!%p165_p2), %v322_v20, %v321_v18  ;;  %v217_v24 = vld [vmem:[%s817_s1 + $0x48] sm:$0xff] (!%p165_p2)  ;;  %v323_v25 = vld [vmem:[%s819_s3 + $0x30] sm:$0xff] (!%p165_p2)  ;;  %v324_v26 = vld [vmem:[%s819_s3 + $0x38] sm:$0xff] (!%p165_p2) }
   0xb   : > { %593 = vmatpush3.bf16.msra.mxu1 (!%p165_p2), %v590_v15  ;;  %v576_v27 = vpack.c.bf16 (!%p165_p2), %v217_v24, %v216_v22  ;;  %v218_v28 = vld [vmem:[%s817_s1 + $0x50] sm:$0xff] (!%p165_p2)  ;;  %v602_v29 = vpack.c.bf16 (!%p165_p2), %v324_v26, %v323_v25  ;;  %v219_v30 = vld [vmem:[%s817_s1 + $0x58] sm:$0xff] (!%p165_p2)  ;;  %v325_v31 = vld [vmem:[%s819_s3 + $0x40] sm:$0xff] (!%p165_p2) }
   0xc   : > { %568 = vmatpush1.bf16.msra.mxu0 (!%p165_p2), %v567_v6  ;;  %595 = vmatprep.subr.bf16.mxu1 (!%p165_p2), %v594_v19  ;;  %v326_v32 = vld [vmem:[%s819_s3 + $0x48] sm:$0xff] (!%p165_p2)  ;;  %v579_v33 = vpack.c.bf16 (!%p165_p2), %v219_v30, %v218_v28  ;;  %v220_v34 = vld [vmem:[%s817_s1 + $0x60] sm:$0xff] (!%p165_p2)  ;;  %v327_v37 = vld [vmem:[%s819_s3 + $0x50] sm:$0xff] (!%p165_p2) }
   0xd   : > { %s822_s23 = smov (!%p192_p3, %s499_s23), 3  ;;  %569 = vmatprep.subr.bf16.mxu0 %v647_v3  ;;  %v606_v35 = vpack.c.bf16 %v326_v32, %v325_v31  ;;  %v221_v36 = vld [vmem:[%s817_s1 + $0x68] sm:$0xff]  ;;  %v328_v38 = vld [vmem:[%s819_s3 + $0x58] sm:$0xff]  ;;  %v222_v41 = vld [vmem:[%s817_s1 + $0x70] sm:$0xff] }
   0xe   : > { %s509_s30 = sshll.u32 %s822_s23, 4  ;;  %v582_v39 = vpack.c.bf16 %v221_v36, %v220_v34  ;;  %v610_v40 = vpack.c.bf16 %v328_v38, %v327_v37  ;;  %v223_v42 = vld [vmem:[%s817_s1 + $0x78] sm:$0xff]  ;;  %v224_v44 = vld [vmem:[%s817_s1 + $0x80] sm:$0xff]  ;;  %v225_v45 = vld [vmem:[%s817_s1 + $0x88] sm:$0xff]  ;;  %s503_s20 = sshll.u32 %s822_s23, 3 }
   0xf   : > { %s707_s7 = scalar_lea.vmem %s816_s0, %s509_s30  ;;  %597 = vmatpush3.bf16.msra.mxu1 %v594_v19  ;;  %v585_v43 = vpack.c.bf16 %v223_v42, %v222_v41  ;;  %v588_v46 = vpack.c.bf16 %v225_v45, %v224_v44  ;;  %v329_v50 = vld [vmem:[%s819_s3 + $0x60] sm:$0xff]  ;;  %v330_v51 = vld [vmem:[%s819_s3 + $0x68] sm:$0xff]  ;;  %v331_v53 = vld [vmem:[%s819_s3 + $0x70] sm:$0xff]  ;;  %s202_s24 = scalar_lea.vmem %s820_s4, %s503_s20 }
  0x10   : > { %v205_v14 = vld [vmem:[%s707_s7 + $0x8] sm:$0xff]  ;;  %571 = vmatpush1.bf16.msra.mxu0 %v570_v12  ;;  %599 = vmatprep.subr.bf16.mxu1 %v598_v23  ;;  %v204_v47 = vld [vmem:[%s707_s7] sm:$0xff]  ;;  %v207_v48 = vld [vmem:[%s707_s7 + $0x18] sm:$0xff]  ;;  %v614_v52 = vpack.c.bf16 %v330_v51, %v329_v50 }
  0x11   : > { %505 = vmatprep.mubr.msk.f32.mxu0 %vm233_vm0, %v205_v14  ;;  %572 = vmatprep.subr.bf16.mxu0 %v647_v3  ;;  %v206_v49 = vld [vmem:[%s707_s7 + $0x10] sm:$0xff]  ;;  %v332_v54 = vld [vmem:[%s819_s3 + $0x78] sm:$0xff]  ;;  %v504_v56 = vld [vmem:[%s818_s2] ss:$0 sm:$0xff] }
  0x12   : > { %v618_v55 = vpack.c.bf16 %v332_v54, %v331_v53 }
  0x13   : > { %601 = vmatpush3.bf16.msra.mxu1 %v598_v23 }
  0x14   : > { %574 = vmatpush1.bf16.msra.mxu0 %v573_v21  ;;  %603 = vmatprep.subr.bf16.mxu1 %v602_v29 }
  0x15   : > { %575 = vmatprep.subr.bf16.mxu0 %v647_v3 }
  0x17   : > { %605 = vmatpush3.bf16.msra.mxu1 %v602_v29 }
  0x18   : > { %577 = vmatpush1.bf16.msra.mxu0 %v576_v27  ;;  %607 = vmatprep.subr.bf16.mxu1 %v606_v35 }
  0x19   : > { %578 = vmatprep.subr.bf16.mxu0 %v647_v3 }
  0x1b   : > { %609 = vmatpush3.bf16.msra.mxu1 %v606_v35 }
  0x1c   : > { %580 = vmatpush1.bf16.msra.mxu0 %v579_v33  ;;  %611 = vmatprep.subr.bf16.mxu1 %v610_v40 }
  0x1d   : > { %581 = vmatprep.subr.bf16.mxu0 %v647_v3 }
  0x1f   : > { %613 = vmatpush3.bf16.msra.mxu1 %v610_v40 }
  0x20   : > { %583 = vmatpush1.bf16.msra.mxu0 %v582_v39  ;;  %615 = vmatprep.subr.bf16.mxu1 %v614_v52 }
  0x21   : > { %584 = vmatprep.subr.bf16.mxu0 %v647_v3 }
  0x23   : > { %617 = vmatpush3.bf16.msra.mxu1 %v614_v52 }
  0x24   : > { %586 = vmatpush1.bf16.msra.mxu0 %v585_v43  ;;  %619 = vmatprep.subr.bf16.mxu1 %v618_v55 }
  0x25   : > { %587 = vmatprep.subr.bf16.mxu0 %v647_v3 }
  0x27   : > { %621 = vmatpush3.bf16.msra.mxu1 %v618_v55 }
  0x28   : > { %589 = vmatpush1.bf16.msra.mxu0 %v588_v46 }
  0x2b   : > { %305 = vmatmul.mubr.f32.vlgmr.msra.gmra.mrb[0].mxu0 %v204_v47 }
  0x2c   : > { %506 = vmatprep.mubr.msk.f32.mxu0 %vm233_vm0, %v207_v48 }
  0x2f   : > { %310 = vmatmul.mubr.f32.gmra.mrb[2].mxu0 %v206_v49 }
  0xfe   : > { %v306_v57 = vpop.f32.mrb[0].mxu0 }
  0xff   : > { %v307_v58 = vadd.f32 %v504_v56, %v306_v57  ;;  %v308_v59 = vpop.f32.mrb[1].mxu0 }
 0x101   : > { %v315_v60 = vmul.f32 %v307_v58, %v307_v58 }
 0x102   : > { %v311_v61 = vpop.f32.mrb[2].mxu0 }
 0x103   : > { %v312_v62 = vadd.f32 %v504_v56, %v311_v61  ;;  %v313_v63 = vpop.f32.mrb[3].mxu0  ;;  %560 = vmatprep.mubr.f32.mxu1 %v315_v60 }
 0x105   : > { %v316_v0 = vmul.f32 %v312_v62, %v312_v62 }
 0x107   : > { %561 = vmatmul.mubr.f32.vlgmr.msra.gmra.mrb[0].mxu1 %v316_v0 }
 0x1da   : > { %v562_v1 = vpop.f32.mrb[0].mxu1 }
 0x1db   : > { %v409_v2 = vadd.f32 1.0, %v562_v1  ;;  %631 = vrsqrt.f32 %v562_v1  ;;  %v399_v3 = vpop.f32.mrb[1].mxu1  ;;  %vm427_vm1 = vcmp.eq.f32.partialorder %v562_v1, inf  ;;  %v430_v15 = vand.u32 2147483648, %v562_v1 }
 0x1dc   : > { %v408_v4 = vadd.f32 1.0, %v399_v3  ;;  %633 = vrsqrt.f32 %v399_v3  ;;  %vm420_vm2 = vcmp.eq.f32.partialorder %v399_v3, inf  ;;  %vm429_vm3 = vcmp.eq.f32.partialorder %v562_v1, 0.0 }
 0x1dd   : > { %635 = vrcp.f32 %v409_v2  ;;  %v423_v19 = vand.u32 2147483648, %v399_v3  ;;  %vm422_vm4 = vcmp.eq.f32.partialorder %v399_v3, 0.0 }
 0x1de   : > { %637 = vrcp.f32 %v408_v4 }
 0x1e5   : > { %v632_v5 = vpop.eup %631 }
 0x1e6   : > { %v634_v6 = vpop.eup %633  ;;  %v426_v7 = vmul.f32 %v632_v5, %v562_v1 }
 0x1e7   : > { %v636_v8 = vpop.eup %635  ;;  %v419_v9 = vmul.f32 %v634_v6, %v399_v3 }
 0x1e8   : > { %v638_v10 = vpop.eup %637  ;;  %v413_v11 = vmul.f32 %v636_v8, %v409_v2  ;;  %v428_v14 = vsel %vm427_vm1, %v562_v1, %v426_v7 }
 0x1e9   : > { %v412_v12 = vmul.f32 %v638_v10, %v408_v4  ;;  %v421_v17 = vsel %vm420_vm2, %v399_v3, %v419_v9  ;;  %v431_v20 = vsel %vm429_vm3, %v430_v15, %v428_v14 }
 0x1ea   : > { %v415_v13 = vsub.f32 2.0, %v413_v11  ;;  %v424_v23 = vsel %vm422_vm4, %v423_v19, %v421_v17 }
 0x1eb   : > { %v414_v16 = vsub.f32 2.0, %v412_v12 }
 0x1ec   : > { %v417_v18 = vmul.f32 %v636_v8, %v415_v13 }
 0x1ed   : > { %v416_v21 = vmul.f32 %v638_v10, %v414_v16 }
 0x1ee   : > { %v433_v22 = vmul.f32 %v431_v20, %v417_v18 }
 0x1ef   : > { %v432_v24 = vmul.f32 %v424_v23, %v416_v21 }
 0x1f0   : > { %v435_v26 = vmul.f32 %v433_v22, %v312_v62 }
 0x1f1   : > { %v434_v25 = vmul.f32 %v432_v24, %v307_v58 }
 0x1f2   : > { %437 = vst [vmem:[%s202_s24 + $0x8] sm:$0xff] %v435_v26 }
 0x1f3   : > { %436 = vst [vmem:[%s202_s24] sm:$0xff] %v434_v25 }
 0x1f4 PF: > { %s14_s15 = sadd.s32 1, %s645_s15  }
 0x1f5   : > { %p11_p4 = scmp.ge.s32.totalorder %s14_s15, 4  }
 0x1f7   :  { %13 = sbr.rel (!%p11_p4) target bundleno = 1 (0x1), region = 66 }

</bundles_post_ra>
